<compile_context>
chip_gen: v5e
topology: v5e:2x2
jax: 0.10.0
libtpu: 0.0.40
codegen_flags: <defaults>
</compile_context>

<pallas_src>
import math
from functools import partial

import jax
import jax.numpy as jnp
from jax.experimental import pallas as pl
from jax.experimental.pallas import tpu as pltpu


def _make_sgc_kernel(act_func):
    """Kernel factory so the (optional) activation is fused into the store epilogue."""

    def kernel(x_ref, k_ref, o_ref):
        # x_ref: (M, N*Cin)   k_ref: (N*Cin, N*Cout)   o_ref: (M, N*Cout)
        acc = jnp.dot(x_ref[...], k_ref[...], preferred_element_type=jnp.float32)
        if act_func is not None:
            # Keep epilogue math in f32 (v5e has no bf16 VPU/EUP); cast only at store.
            acc = act_func(acc)
        o_ref[...] = acc.astype(o_ref.dtype)

    return kernel


def build_chebyshev_basis(laplacian, cs):
    """Reproduce the exact T_k sequence used by chebyshev_convolution (bug included:
    tk_prev is never updated inside the loop, matching the PyTorch module)."""
    n = laplacian.shape[0]
    t0 = jnp.eye(n, dtype=laplacian.dtype)
    ts = [t0, laplacian]
    if cs > 2:
        tk_prev = laplacian
        tk = 2.0 * jnp.matmul(laplacian, laplacian) - t0
        for _ in range(2, cs):
            ts.append(tk)
            tk = 2.0 * jnp.matmul(laplacian, tk) - tk_prev  # tk_prev stays = laplacian
    return jnp.stack(ts[:cs], axis=0)  # (cs, N, N)


def build_sgc_operator(laplacian, weights):
    """Fold the cs-loop of (T_k @ X) @ W_k into one combined operator.

      out[n, co] = sum_{m, ci} ( sum_k T_k[n, m] * W_k[ci, co] ) * X[m, ci]
    """
    cs, c_in, c_out = weights.shape
    n = laplacian.shape[0]
    t_stack = build_chebyshev_basis(laplacian, cs)            # (cs, N, N)
    k_op = jnp.einsum("knm,kio->mino", t_stack, weights)      # (N, Cin, N, Cout)
    return k_op.reshape(n * c_in, n * c_out)


def _sgc_pallas_matmul(x_flat, k_op, act_func, out_dtype):
    """Single-step pallas_call: (M, K) @ (K, Nout) with fused activation epilogue."""
    M, K = x_flat.shape
    _, Nout = k_op.shape
    return pl.pallas_call(
        _make_sgc_kernel(act_func),
        out_shape=jax.ShapeDtypeStruct((M, Nout), out_dtype),
        grid_spec=pltpu.PrefetchScalarGridSpec(
            num_scalar_prefetch=0,
            grid=(1,),  # single grid step: avoids per-step overhead on 1-TC parts,
                        # and the 2-way split can't amortize dispatch even on v7x here.
            in_specs=[
                pl.BlockSpec((M, K), lambda i: (0, 0)),
                pl.BlockSpec((K, Nout), lambda i: (0, 0)),
            ],
            out_specs=pl.BlockSpec((M, Nout), lambda i: (0, 0)),
        ),
        compiler_params=pltpu.CompilerParams(
            dimension_semantics=("arbitrary",),
            # NOTE: set vmem_limit_bytes explicitly (with double-buffer headroom) once
            # tiles grow beyond the toy shape; unnecessary at (16x64)@(64x128).
        ),
    )(x_flat, k_op)


def make_sgc_apply(laplacian, weights, act_func=None, use_bf16=False):
    """Build K_op once (cached outside the hot path) and return a jitted apply(x)."""
    k_op = build_sgc_operator(laplacian, weights)             # (N*Cin, N*Cout), f32
    n = laplacian.shape[0]
    c_out = weights.shape[2]
    k_op_in = k_op.astype(jnp.bfloat16) if use_bf16 else k_op

    @jax.jit
    def apply(x):
        B, T, N, Cin = x.shape
        x_flat = x.reshape(B * T, N * Cin)
        if use_bf16:
            x_flat = x_flat.astype(jnp.bfloat16)
        out_flat = _sgc_pallas_matmul(x_flat, k_op_in, act_func, jnp.float32)
        return out_flat.reshape(B, T, n, c_out).astype(x.dtype)

    return apply


def sgc_forward(laplacian, weights, x, act_func=None, use_bf16=False):
    """One-shot convenience wrapper (builds K_op each call; prefer make_sgc_apply)."""
    return make_sgc_apply(laplacian, weights, act_func, use_bf16)(x)


def sgc_reference(laplacian, weights, x, cs, act_func=None):
    """Pure-JAX transcription of chebyshev_convolution for verification."""
    n = laplacian.shape[0]
    t0 = jnp.eye(n, dtype=laplacian.dtype)
    out = jnp.matmul(jnp.matmul(t0, x), weights[0])
    out = out + jnp.matmul(jnp.matmul(laplacian, x), weights[1])
    tk_prev = laplacian
    tk = 2.0 * jnp.matmul(laplacian, laplacian) - t0
    for k in range(2, cs):
        out = out + jnp.matmul(jnp.matmul(tk, x), weights[k])
        tk = 2.0 * jnp.matmul(laplacian, tk) - tk_prev
    if act_func is not None:
        out = act_func(out)
    return out


if __name__ == "__main__":
    # x: (batch_size, time_steps, num_nodes, c_in)
    B, T, N, C_IN, C_OUT, CS = 2, 8, 16, 4, 8, 3

    key = jax.random.PRNGKey(0)
    k_ws, k_ts, k_x = jax.random.split(key, 3)

    # reset_parameters(): uniform(-std, std) with std = 0.1 / sqrt(param.size(1))
    std_ws = 0.1 / math.sqrt(N)      # ws is (N, N) -> size(1) == N
    std_ts = 0.1 / math.sqrt(C_IN)   # ts is (cs, c_in, c_out) -> size(1) == c_in
    ws = jax.random.uniform(k_ws, (N, N), jnp.float32, -std_ws, std_ws)
    ts = jax.random.uniform(k_ts, (CS, C_IN, C_OUT), jnp.float32, -std_ts, std_ts)

    x = jax.random.normal(k_x, (B, T, N, C_IN), jnp.float32)

    # Module default: act_func=None. K_op built once, apply() is the jitted hot path.
    sgc_apply = make_sgc_apply(ws, ts, act_func=None)
    out = jax.block_until_ready(sgc_apply(x))

    ref = jax.block_until_ready(sgc_reference(ws, ts, x, CS, act_func=None))
    assert out.shape == (B, T, N, C_OUT), out.shape
    assert jnp.allclose(out, ref, atol=1e-5, rtol=1e-4), float(jnp.max(jnp.abs(out - ref)))

    # Also exercise the fused activation epilogue (ReLU) against the reference.
    sgc_apply_relu = make_sgc_apply(ws, ts, act_func=jax.nn.relu)
    out_relu = jax.block_until_ready(sgc_apply_relu(x))
    ref_relu = jax.block_until_ready(sgc_reference(ws, ts, x, CS, act_func=jax.nn.relu))
    assert jnp.allclose(out_relu, ref_relu, atol=1e-5, rtol=1e-4), float(
        jnp.max(jnp.abs(out_relu - ref_relu))
    )

    print("KERNEL_OK")
</pallas_src>

<mosaic_0001>
module attributes {stable_mosaic.version = 11 : i64} {
  func.func @kernel(%arg0: i32, %arg1: memref<16x64xf32, #tpu.memory_space<vmem>>, %arg2: memref<64x128xf32, #tpu.memory_space<vmem>>, %arg3: memref<16x128xf32, #tpu.memory_space<vmem>>) attributes {dimension_semantics = [#tpu.dimension_semantics<arbitrary>], iteration_bounds = array<i64: 1>, scalar_prefetch = 0 : i64, scratch_operands = 0 : i64, tpu.core_type = #tpu.core_type<tc>, window_params = [{pipeline_mode = #tpu.pipeline_mode<synchronous>, transform_indices = @transform_0, window_bounds = array<i64: 16, 64>}, {pipeline_mode = #tpu.pipeline_mode<synchronous>, transform_indices = @transform_1, window_bounds = array<i64: 64, 128>}, {pipeline_mode = #tpu.pipeline_mode<synchronous>, transform_indices = @transform_2, window_bounds = array<i64: 16, 128>}]} {
    %c0 = arith.constant 0 : index
    %c0_0 = arith.constant 0 : index
    %0 = vector.load %arg1[%c0, %c0_0] : memref<16x64xf32, #tpu.memory_space<vmem>>, vector<16x64xf32>
    %c0_1 = arith.constant 0 : index
    %c0_2 = arith.constant 0 : index
    %1 = vector.load %arg2[%c0_1, %c0_2] : memref<64x128xf32, #tpu.memory_space<vmem>>, vector<64x128xf32>
    %cst = arith.constant dense<0.000000e+00> : vector<16x128xf32>
    %2 = tpu.matmul %0, %1, %cst {dimension_numbers = #tpu.dot_dimension_numbers<[1], [0], [0], [1], [0, 0, 1, 1], [], []>} : vector<16x64xf32>, vector<64x128xf32>, vector<16x128xf32> -> vector<16x128xf32>
    %c0_3 = arith.constant 0 : index
    %c0_4 = arith.constant 0 : index
    %3 = vector.load %arg3[%c0_3, %c0_4] : memref<16x128xf32, #tpu.memory_space<vmem>>, vector<16x128xf32>
    tpu.vector_store %arg3[%c0_3, %c0_4], %2 {strides = array<i32>} : memref<16x128xf32, #tpu.memory_space<vmem>>, vector<16x128xf32>,
    return
  }
  func.func @transform_0(%arg0: i32) -> (i32, i32) {
    %c0_i32 = arith.constant 0 : i32
    %c0_i32_0 = arith.constant 0 : i32
    %c0_i32_1 = arith.constant 0 : i32
    return %c0_i32, %c0_i32_0 : i32, i32
  }
  func.func @transform_1(%arg0: i32) -> (i32, i32) {
    %c0_i32 = arith.constant 0 : i32
    %c0_i32_0 = arith.constant 0 : i32
    %c0_i32_1 = arith.constant 0 : i32
    return %c0_i32, %c0_i32_0 : i32, i32
  }
  func.func @transform_2(%arg0: i32) -> (i32, i32) {
    %c0_i32 = arith.constant 0 : i32
    %c0_i32_0 = arith.constant 0 : i32
    %c0_i32_1 = arith.constant 0 : i32
    return %c0_i32, %c0_i32_0 : i32, i32
  }
}

</mosaic_0001>

<bundles_post_ra>
// kernel: apply.1
= control target key start
LH: loop header
LB: loop body
LE: loop exit
PB: predicated region body
PF: predicated region fallthrough
CT: control target
= control target key end

     0   :  { %vm21_vm0 = vcmask 523264   ;;  %s118_s1 = inlined_call_operand.vmem [shape: f32[64,128], index: 1, kind: input, shape index: {}]   ;;  %s119_s0 = inlined_call_operand.vmem [shape: f32[16,64], index: 0, kind: input, shape index: {}]   ;;  %s120_s2 = inlined_call_operand.vmem [shape: f32[16,128], index: 2, kind: output, shape index: {}]  }
   0x1   :  { %v20_v0 = vld [vmem:[%s118_s1 + $0x38] sm:$0xff]  ;;  %v19_v1 = vld [vmem:[%s118_s1 + $0x30] sm:$0xff]  ;;  %v18_v2 = vld [vmem:[%s118_s1 + $0x28] sm:$0xff] }
   0x2   :  { %36 = vmatpush.msra.mxu0 %v20_v0  ;;  %59 = vmatpush.msra.mxu1 %v20_v0  ;;  %v17_v3 = vld [vmem:[%s118_s1 + $0x20] sm:$0xff]  ;;  %v16_v4 = vld [vmem:[%s118_s1 + $0x18] sm:$0xff]  ;;  %v15_v5 = vld [vmem:[%s118_s1 + $0x10] sm:$0xff] }
   0x3   :  { %v14_v6 = vld [vmem:[%s118_s1 + $0x8] sm:$0xff]  ;;  %v13_v7 = vld [vmem:[%s118_s1] sm:$0xff] }
   0x4   :  { %37 = vmatpush.msra.mxu0 %v19_v1  ;;  %60 = vmatpush.msra.mxu1 %v19_v1  ;;  %v11_v8 = vld [vmem:[%s119_s0] sm:$0xff]  ;;  %v12_v9 = vld [vmem:[%s119_s0 + $0x8] sm:$0xff] }
   0x6   :  { %38 = vmatpush.msra.mxu0 %v18_v2  ;;  %61 = vmatpush.msra.mxu1 %v18_v2 }
   0x8   :  { %39 = vmatpush.msra.mxu0 %v17_v3  ;;  %62 = vmatpush.msra.mxu1 %v17_v3 }
   0xa   :  { %40 = vmatpush.msra.mxu0 %v16_v4  ;;  %63 = vmatpush.msra.mxu1 %v16_v4 }
   0xc   :  { %41 = vmatpush.msra.mxu0 %v15_v5  ;;  %64 = vmatpush.msra.mxu1 %v15_v5 }
   0xe   :  { %42 = vmatpush.msra.mxu0 %v14_v6  ;;  %65 = vmatpush.msra.mxu1 %v14_v6 }
  0x10   :  { %43 = vmatpush.msra.mxu0 %v13_v7  ;;  %66 = vmatpush.msra.mxu1 %v13_v7 }
  0x11   :  { %57 = vmatmul.msk.f32.vlgmr.msra.gmra.mxu0 %vm21_vm0, %v11_v8  ;;  %58 = vmatmul.msk.f32.vlgmr.msra.gmra.mxu1 %vm21_vm0, %v12_v9 }
  0x8e   :  { %v45_v10 = vpop.f32.mrf.mxu0  ;;  %v48_v11 = vpop.f32.mrf.mxu1 }
  0x8f   :  { %51 = vst [vmem:[%s120_s2] sm:$0xff] %v45_v10 }
  0x90   :  { %52 = vst [vmem:[%s120_s2 + $0x8] sm:$0xff] %v48_v11 }

</bundles_post_ra>
